<compile_context>
chip_gen: v5e
topology: v5e:2x2
jax: 0.10.0
libtpu: 0.0.40
codegen_flags: <defaults>
</compile_context>

<pallas_src>
import functools
import math

import jax
import jax.numpy as jnp
from jax.experimental import pallas as pl
from jax.experimental.pallas import tpu as pltpu

_LANE_COLS = 512        # block width (multiple of 128), bounds block bytes
_MAX_TILE_ROWS = 2048   # ~4 MiB per f32 input block; 3 inputs x 2 bufs + acc ~ 22 MiB VMEM
_NUM_PARALLEL = 2       # leading 'parallel' axis (v7x: 2 TCs; degenerate elsewhere)


def _round_up(x, m):
    return ((x + m - 1) // m) * m


def _per_pixel_l1_kernel(nan_value, pred_ref, tgt_ref, mask_ref, out_ref, acc_ref):
    # nan_value is a plain Python float (compile-time literal) -> no captured consts.
    i = pl.program_id(1)          # reduction axis (last grid dim, 'arbitrary')

    @pl.when(i == 0)
    def _():
        acc_ref[...] = jnp.zeros_like(acc_ref)

    # Upcast inside the kernel; inputs may arrive as bf16 to halve HBM traffic.
    pred = pred_ref[...].astype(jnp.float32)
    tgt = tgt_ref[...].astype(jnp.float32)

    invalid = jnp.logical_or(mask_ref[...] != 0, tgt == nan_value)
    diff = jnp.abs(pred - tgt)
    # Element-wise accumulate (VPU only; no per-step XLU reduce, no scalar RMW).
    acc_ref[...] += jnp.where(invalid, 0.0, diff)

    @pl.when(i == pl.num_programs(1) - 1)
    def _():
        # One sublane reduce per core; lane-dense (1,1,lane_cols) partial output.
        col_sums = jnp.sum(acc_ref[...], axis=0, keepdims=True)   # (1, lane_cols)
        out_ref[...] = col_sums[None]                             # (1, 1, lane_cols)


def per_pixel_l1(prediction, target, masks, nan_placeholder=-2.0,
                 lane_cols=_LANE_COLS, max_tile_rows=_MAX_TILE_ROWS,
                 num_parallel=_NUM_PARALLEL):
    """Masked L1 sum over NCHW inputs. Returns a float32 scalar."""
    assert prediction.shape == target.shape == masks.shape
    n = math.prod(prediction.shape)

    # Flatten to 1-D; keep native dtypes for pred/target, mask as int8 (not f32).
    pred = prediction.reshape(-1)
    tgt = target.reshape(-1)
    msk = masks.reshape(-1).astype(jnp.int8)   # 1 == drop this pixel from the loss

    # Lane-dense 2-D layout: (rows, lane_cols). Row tile from a VMEM byte budget;
    # multiple of 32 so the int8 mask block satisfies the (32, 128) packing tile.
    rows = (n + lane_cols - 1) // lane_cols
    tile_rows = min(max_tile_rows, _round_up(rows, 32))
    rows_padded = _round_up(rows, num_parallel * tile_rows)
    n_padded = rows_padded * lane_cols

    pad = n_padded - n
    if pad:
        # Padding contributes exactly 0 (pred=tgt=0 and mask=1 -> invalid).
        # TODO(synk): for large unaligned shapes, replace this copy with in-kernel
        # bounds masking (cdiv grid + iota mask) to avoid the extra HBM pass.
        pred = jnp.pad(pred, (0, pad))
        tgt = jnp.pad(tgt, (0, pad))
        msk = jnp.pad(msk, (0, pad), constant_values=1)

    pred2 = pred.reshape(rows_padded, lane_cols)
    tgt2 = tgt.reshape(rows_padded, lane_cols)
    msk2 = msk.reshape(rows_padded, lane_cols)

    inner_steps = rows_padded // (num_parallel * tile_rows)
    grid = (num_parallel, inner_steps)

    def in_map(p, i):
        return (p * inner_steps + i, 0)

    kernel = functools.partial(_per_pixel_l1_kernel, float(nan_placeholder))

    partials = pl.pallas_call(
        kernel,
        out_shape=jax.ShapeDtypeStruct((num_parallel, 1, lane_cols), jnp.float32),
        grid_spec=pltpu.PrefetchScalarGridSpec(
            num_scalar_prefetch=0,
            grid=grid,
            in_specs=[
                pl.BlockSpec((tile_rows, lane_cols), in_map),   # prediction
                pl.BlockSpec((tile_rows, lane_cols), in_map),   # target
                pl.BlockSpec((tile_rows, lane_cols), in_map),   # mask (int8)
            ],
            out_specs=pl.BlockSpec((1, 1, lane_cols), lambda p, i: (p, 0, 0)),
            scratch_shapes=[pltpu.VMEM((tile_rows, lane_cols), jnp.float32)],
        ),
        compiler_params=pltpu.CompilerParams(
            dimension_semantics=("parallel", "arbitrary"),
            vmem_limit_bytes=48 * 1024 * 1024,
        ),
    )(pred2, tgt2, msk2)

    # Tiny final reduction over (num_parallel, 1, lane_cols) partial sums in XLA.
    return jnp.sum(partials)


def _reference(prediction, target, masks, nan_placeholder=-2.0):
    invalid = jnp.logical_or(masks, target == nan_placeholder)
    diff = jnp.abs(prediction - target)
    return jnp.sum(jnp.where(invalid, 0.0, diff))


if __name__ == "__main__":
    key = jax.random.PRNGKey(0)
    k1, k2, k3, k4 = jax.random.split(key, 4)

    B, C, H, W = 2, 4, 16, 16  # NCHW
    nan_placeholder = -2.0

    prediction = jax.random.normal(k1, (B, C, H, W), dtype=jnp.float32)
    target = jax.random.normal(k2, (B, C, H, W), dtype=jnp.float32)
    # Inject some "NaN placeholder" pixels into the target.
    nan_sites = jax.random.bernoulli(k3, 0.1, (B, C, H, W))
    target = jnp.where(nan_sites, jnp.float32(nan_placeholder), target)
    # Boolean mask (True -> pixel is zeroed out of the loss), like the torch module.
    masks = jax.random.bernoulli(k4, 0.3, (B, C, H, W))

    loss = per_pixel_l1(prediction, target, masks, nan_placeholder)
    loss = jax.block_until_ready(loss)

    ref = _reference(prediction, target, masks, nan_placeholder)
    assert jnp.allclose(loss, ref, rtol=1e-5, atol=1e-5), (loss, ref)

    print("KERNEL_OK")
</pallas_src>

<mosaic_0001>
module attributes {stable_mosaic.version = 11 : i64} {
  func.func @_per_pixel_l1_kernel(%arg0: i32, %arg1: i32, %arg2: memref<32x512xf32, #tpu.memory_space<vmem>>, %arg3: memref<32x512xf32, #tpu.memory_space<vmem>>, %arg4: memref<32x512xi8, #tpu.memory_space<vmem>>, %arg5: memref<1x1x512xf32, #tpu.memory_space<vmem>>, %arg6: memref<32x512xf32, #tpu.memory_space<vmem>>) attributes {dimension_semantics = [#tpu.dimension_semantics<parallel>, #tpu.dimension_semantics<arbitrary>], iteration_bounds = array<i64: 2, 1>, scalar_prefetch = 0 : i64, scratch_operands = 1 : i64, tpu.core_type = #tpu.core_type<tc>, window_params = [{transform_indices = @transform_0, window_bounds = array<i64: 32, 512>}, {transform_indices = @transform_1, window_bounds = array<i64: 32, 512>}, {transform_indices = @transform_2, window_bounds = array<i64: 32, 512>}, {transform_indices = @transform_3, window_bounds = array<i64: 1, 1, 512>}]} {
    %c0_i32 = arith.constant 0 : i32
    %0 = arith.cmpi eq, %arg1, %c0_i32 : i32
    %1 = arith.extui %0 : i1 to i32
    %c0_i32_0 = arith.constant 0 : i32
    %2 = arith.cmpi ne, %1, %c0_i32_0 : i32
    scf.if %2 {
      %cst_13 = arith.constant 0.000000e+00 : f32
      %21 = vector.broadcast %cst_13 : f32 to vector<32x512xf32>
      %c0_14 = arith.constant 0 : index
      %c0_15 = arith.constant 0 : index
      %22 = vector.load %arg6[%c0_14, %c0_15] : memref<32x512xf32, #tpu.memory_space<vmem>>, vector<32x512xf32>
      tpu.vector_store %arg6[%c0_14, %c0_15], %21 {strides = array<i32>} : memref<32x512xf32, #tpu.memory_space<vmem>>, vector<32x512xf32>,
    } else {
    }
    %c0 = arith.constant 0 : index
    %c0_1 = arith.constant 0 : index
    %3 = vector.load %arg2[%c0, %c0_1] : memref<32x512xf32, #tpu.memory_space<vmem>>, vector<32x512xf32>
    %c0_2 = arith.constant 0 : index
    %c0_3 = arith.constant 0 : index
    %4 = vector.load %arg3[%c0_2, %c0_3] : memref<32x512xf32, #tpu.memory_space<vmem>>, vector<32x512xf32>
    %c0_4 = arith.constant 0 : index
    %c0_5 = arith.constant 0 : index
    %5 = vector.load %arg4[%c0_4, %c0_5] : memref<32x512xi8, #tpu.memory_space<vmem>>, vector<32x512xi8>
    %c0_i8 = arith.constant 0 : i8
    %6 = vector.broadcast %c0_i8 : i8 to vector<32x512xi8>
    %7 = arith.cmpi ne, %5, %6 : vector<32x512xi8>
    %cst = arith.constant -2.000000e+00 : f32
    %8 = vector.broadcast %cst : f32 to vector<32x512xf32>
    %9 = arith.cmpf oeq, %4, %8 : vector<32x512xf32>
    %10 = arith.ori %7, %9 : vector<32x512xi1>
    %11 = arith.subf %3, %4 : vector<32x512xf32>
    %12 = math.absf %11 : vector<32x512xf32>
    %c0_6 = arith.constant 0 : index
    %c0_7 = arith.constant 0 : index
    %13 = vector.load %arg6[%c0_6, %c0_7] : memref<32x512xf32, #tpu.memory_space<vmem>>, vector<32x512xf32>
    %cst_8 = arith.constant 0.000000e+00 : f32
    %14 = vector.broadcast %cst_8 : f32 to vector<32x512xf32>
    %15 = arith.select %10, %14, %12 : vector<32x512xi1>, vector<32x512xf32>
    %16 = arith.addf %13, %15 : vector<32x512xf32>
    %c0_9 = arith.constant 0 : index
    %c0_10 = arith.constant 0 : index
    %17 = vector.load %arg6[%c0_9, %c0_10] : memref<32x512xf32, #tpu.memory_space<vmem>>, vector<32x512xf32>
    tpu.vector_store %arg6[%c0_9, %c0_10], %16 {strides = array<i32>} : memref<32x512xf32, #tpu.memory_space<vmem>>, vector<32x512xf32>,
    %c0_i32_11 = arith.constant 0 : i32
    %18 = arith.cmpi eq, %arg1, %c0_i32_11 : i32
    %19 = arith.extui %18 : i1 to i32
    %c0_i32_12 = arith.constant 0 : i32
    %20 = arith.cmpi ne, %19, %c0_i32_12 : i32
    scf.if %20 {
      %c0_13 = arith.constant 0 : index
      %c0_14 = arith.constant 0 : index
      %21 = vector.load %arg6[%c0_13, %c0_14] : memref<32x512xf32, #tpu.memory_space<vmem>>, vector<32x512xf32>
      %cst_15 = arith.constant dense<0.000000e+00> : vector<512xf32>
      %22 = vector.multi_reduction <add>, %21, %cst_15 [0] : vector<32x512xf32> to vector<512xf32>
      %23 = vector.shape_cast %22 : vector<512xf32> to vector<1x512xf32>
      %24 = vector.shape_cast %23 : vector<1x512xf32> to vector<1x1x512xf32>
      %c0_16 = arith.constant 0 : index
      %c0_17 = arith.constant 0 : index
      %c0_18 = arith.constant 0 : index
      %25 = vector.load %arg5[%c0_16, %c0_17, %c0_18] : memref<1x1x512xf32, #tpu.memory_space<vmem>>, vector<1x1x512xf32>
      tpu.vector_store %arg5[%c0_16, %c0_17, %c0_18], %24 {strides = array<i32>} : memref<1x1x512xf32, #tpu.memory_space<vmem>>, vector<1x1x512xf32>,
    } else {
    }
    return
  }
  func.func @transform_0(%arg0: i32, %arg1: i32) -> (i32, i32) {
    %c1_i32 = arith.constant 1 : i32
    %0 = arith.muli %arg0, %c1_i32 : i32
    %1 = arith.addi %0, %arg1 : i32
    %c0_i32 = arith.constant 0 : i32
    %c0_i32_0 = arith.constant 0 : i32
    return %1, %c0_i32 : i32, i32
  }
  func.func @transform_1(%arg0: i32, %arg1: i32) -> (i32, i32) {
    %c1_i32 = arith.constant 1 : i32
    %0 = arith.muli %arg0, %c1_i32 : i32
    %1 = arith.addi %0, %arg1 : i32
    %c0_i32 = arith.constant 0 : i32
    %c0_i32_0 = arith.constant 0 : i32
    return %1, %c0_i32 : i32, i32
  }
  func.func @transform_2(%arg0: i32, %arg1: i32) -> (i32, i32) {
    %c1_i32 = arith.constant 1 : i32
    %0 = arith.muli %arg0, %c1_i32 : i32
    %1 = arith.addi %0, %arg1 : i32
    %c0_i32 = arith.constant 0 : i32
    %c0_i32_0 = arith.constant 0 : i32
    return %1, %c0_i32 : i32, i32
  }
  func.func @transform_3(%arg0: i32, %arg1: i32) -> (i32, i32, i32) {
    %c0_i32 = arith.constant 0 : i32
    %c0_i32_0 = arith.constant 0 : i32
    %c0_i32_1 = arith.constant 0 : i32
    return %arg0, %c0_i32, %c0_i32_0 : i32, i32, i32
  }
}

</mosaic_0001>

<bundles_post_ra>
// kernel: tpu_custom_call.1
= control target key start
LH: loop header
LB: loop body
LE: loop exit
PB: predicated region body
PF: predicated region fallthrough
CT: control target
= control target key end

     0   :  { %s1621_s0 = inlined_call_operand.hbm [shape: f32[64,512], index: 0, kind: input, shape index: {}]   ;;  %s1622_s1 = inlined_call_operand.hbm [shape: f32[64,512], index: 1, kind: input, shape index: {}]   ;;  %s1623_s2 = inlined_call_operand.hbm [shape: s8[64,512], index: 2, kind: input, shape index: {}]   ;;  %s1624_s3 = inlined_call_operand.hbm [shape: f32[2,1,512], index: 3, kind: output, shape index: {}]  }
   0x1   :  { %1633 = sst [smem:[#allocation20_spill]] %s1622_s1 }
   0x2   :  { %8 = vsyncpa [#allocation4], 0 }
   0x3   :  { %10 = vsyncpa [#allocation4 + $0x1], 0 }
   0x4   :  { %11 = vsyncpa [#allocation7], 0 }
   0x5   :  { %13 = vsyncpa [#allocation7 + $0x1], 0 }
   0x6   :  { %14 = vsyncpa [#allocation5], 0 }
   0x7   :  { %16 = vsyncpa [#allocation5 + $0x1], 0  ;;  %s1091_s12 = smov 0   ;;  %s1093_s13 = smov 0  }
   0x8   :  { %s1095_s14 = smov 0   ;;  %s1097_s15 = smov 0  }
   0x9   :  { %s1099_s16 = smov 0   ;;  %s1101_s17 = smov 0  }
   0xa LB: > { %1634 = sst [smem:[#allocation13_spill]] %s1046_s12  ;;  %s1122_s18 = sadd.s32 4294967295, %s1066_s17   ;;  %s1066_s17 = sphi %s1101_s17, %s22_s17   ;;  %s1062_s16 = sphi %s1099_s16, %s1694_s16   ;;  %s1058_s15 = sphi %s1097_s15, %s1693_s15   ;;  %s1054_s14 = sphi %s1095_s14, %s1689_s14   ;;  %s1050_s13 = sphi %s1093_s13, %s1692_s13   ;;  %s1046_s12 = sphi %s1091_s12, %s1691_s12  }
   0xb   : > { %1635 = sst [smem:[#allocation14_spill]] %s1054_s14  ;;  %s787_s19 = sadd.s32 4294967294, %s1066_s17  }
   0xc   : > { %1636 = sst [smem:[#allocation15_spill]] %s1066_s17  ;;  %s34_s20 = sadd.s32 1, %s1062_s16 }
   0xd   : > { %s43_s21 = sadd.s32 1, %s1054_s14  ;;  %p36_p0 = scmp.ge.s32.totalorder %s34_s20, 2 }
   0xe   : > { %p50_p1 = scmp.ne.s32.totalorder %s1054_s14, %s1050_s13  ;;  %p51_p2 = scmp.eq.s32.totalorder %s1066_s17, 0 }
   0xf   : > { %p56_p3 = scmp.ne.s32.totalorder %s1050_s13, %s1046_s12  ;;  %s1696_s20 = smov (%p36_p0, %s34_s20), 0 }
  0x10   : > { %1637 = sst [smem:[#allocation16_spill]] %s1696_s20  ;;  %p1134_p4 = por %p51_p2, %p50_p1 }
  0x11   : > { %p57_p5 = scmp.eq.s32.totalorder %s1122_s18, 0  ;;  %s40_s23 = ssub.s32 %s1062_s16, %s1696_s20 }
  0x12   : > { %p136_p6 = scmp.eq.s32.totalorder %s1122_s18, 1  ;;  %p41_p7 = scmp.eq.s32.totalorder %s40_s23, 0 }
  0x13   : > { %p1142_p8 = por %p57_p5, %p56_p3  ;;  %p142_p10 = scmp.eq.s32.totalorder %s787_s19, 1 }
  0x14   : > { %p1146_p9 = por %p136_p6, %p50_p1  ;;  %p789_p12 = scmp.ge.s32.totalorder %s1066_s17, 2 }
  0x15   : > { %s1151_s26 = scalar_select %p41_p7, %s1054_s14, %s43_s21  }
  0x16   : > { %s1640_s25 = scalar_select %p1146_p9, 1, 0 }
  0x17   : > { %1642 = sst [smem:[#allocation18_spill]] %s1151_s26  ;;  %p1153_p11 = por %p142_p10, %p56_p3 }
  0x18   : > { %1641 = sst [smem:[#allocation17_spill]] %s1640_s25  ;;  %p837_p13 = scmp.lt.s32.totalorder %s1066_s17, 2 }
  0x19   : > { %s1643_s27 = scalar_select %p1153_p11, 1, 0 }
  0x1a   : > { %s1160_s28 = sand.u32 1, %s1054_s14   ;;  %s811_s30 = sshll.u32 %s1062_s16, 7 }
  0x1b   : > { %1644 = sst [smem:[#allocation19_spill]] %s1643_s27  ;;  %s790_s29 = sshll.u32 %s1160_s28, 7 }
  0x1c   : > { %p1166_p0 = pnand %p837_p13, %p1134_p4  ;;  %s186_s5 = sand.u32 1, %s1066_s17  }
  0x1d   : > { %s1646_s1 = sld [smem:[#allocation20_spill]]  ;;  %s190_s10 = scalar_lea.vmem [#allocation6], %s790_s29 }
  0x1e   : > { %s200_s11 = sshll.u32 %s190_s10, 4  ;;  %s187_s19 = scalar_lea.sflag [#allocation7], %s186_s5  ;;  %s201_s11 = int_to_ptr.vmem [resolvable:$true] %s200_s11 }
  0x1f   : > { %s1068_s21 = smov 512   ;;  %s1069_s22 = smov 32  }
  0x20   : > { %p801_p1 = scmp.ge.s32.totalorder %s1066_s17, 1  ;;  %p229_p2 = scmp.lt.s32.totalorder %s1066_s17, 3 }
  0x21   : > { %s163_s5 = scalar_lea.sflag [#allocation4], %s1160_s28 }
  0x22   : > { %p1178_p3 = pnand %p801_p1, %p229_p2 }
  0x23   : > { %s197_s8 = scalar_lea.hbm %s1646_s1, %s811_s30  ;;  %s166_s1 = scalar_lea.vmem [#allocation3], %s790_s29 }
  0x24   : > { %s198_s9 = sshll.u32 %s197_s8, 4  ;;  %s173_s8 = scalar_lea.hbm %s1621_s0, %s811_s30  ;;  %s199_s9 = int_to_ptr.hbm [resolvable:$true] %s198_s9 }
  0x25   : > { %829 = dma.hbm_to_vmem [thread:$0]  (!%p1166_p0), %s199_s9, 2048, %s201_s11, %s187_s19, %s1068_s21, %s1068_s21, %s1069_s22  }
  0x26   : > { %s174_s10 = sshll.u32 %s173_s8, 4  ;;  %s176_s20 = sshll.u32 %s166_s1, 4  ;;  %s175_s10 = int_to_ptr.hbm [resolvable:$true] %s174_s10  ;;  %s177_s20 = int_to_ptr.vmem [resolvable:$true] %s176_s20 }
  0x27   : > { %826 = dma.hbm_to_vmem [thread:$0]  (!%p1166_p0), %s175_s10, 2048, %s177_s20, %s163_s5, %s1068_s21, %s1068_s21, %s1069_s22  }
  0x28   : > { %s798_s9 = sshll.u32 %s1160_s28, 5  ;;  %s814_s11 = sshll.u32 %s1062_s16, 5 }
  0x29   : > { %s220_s17 = scalar_lea.hbm %s1623_s2, %s814_s11  ;;  %s214_s12 = scalar_lea.vmem [#allocation8], %s798_s9 }
  0x2a   : > { %s222_s27 = sshll.u32 %s220_s17, 4  ;;  %s224_s25 = sshll.u32 %s214_s12, 4  ;;  %s223_s27 = int_to_ptr.hbm [resolvable:$true] %s222_s27  ;;  %s225_s25 = int_to_ptr.vmem [resolvable:$true] %s224_s25 }
  0x2b   : > { %832 = dma.hbm_to_vmem [thread:$0]  (!%p1166_p0), %s223_s27, 512, %s225_s25, %s187_s19  }
  0x2c   : > { %233 = sbr.rel (%p1178_p3) target bundleno = 120 (0x78), region = 32  ;;  %s1198_s1 = sand.u32 (!%p1178_p3), 1, %s1050_s13  }
  0x2d   : > { %s802_s20 = sshll.u32 (!%p1178_p3), %s1198_s1, 7  ;;  %s236_s28 = scalar_lea.sflag (!%p1178_p3), [#allocation4], %s1198_s1 }
  0x2e   : > { %s1202_s14 = scalar_lea.vmem (!%p1178_p3), [#allocation3], %s802_s20 }
  0x31   : > { %1033 = dma.done.wait (%p1142_p8), %s236_s28, 2048  }
  0x32   : > { %1035 = vsyncadd (%p1142_p8), %s236_s28, 4294965248  ;;  %s245_s12 = sand.u32 1, %s1122_s18   ;;  %s1209_s25 = scalar_lea.vmem [#allocation6], %s802_s20 }
  0x33   : > { %s246_s17 = scalar_lea.sflag [#allocation7], %s245_s12 }
  0x34   : > { %1037 = dma.done.wait (%p1142_p8), %s246_s17, 2560  }
  0x35   : > { %1039 = vsyncadd (%p1142_p8), %s246_s17, 4294964736  ;;  %v1216_v0 = vld [vmem:[%s1202_s14] sm:$0xff]  ;;  %s804_s18 = sshll.u32 %s1198_s1, 5  ;;  %v1226_v3 = vld [vmem:[%s1202_s14 + $0x8] sm:$0xff]  ;;  %v1070_v25 = vmov 0   ;;  %s805_s26 = sshll.u32 %s1198_s1, 2 }
  0x36   : > { %v1219_v1 = vld [vmem:[%s1209_s25] sm:$0xff]  ;;  %v1229_v4 = vld [vmem:[%s1209_s25 + $0x8] sm:$0xff]  ;;  %v1232_v5 = vld [vmem:[%s1209_s25 + $0x10] sm:$0xff]  ;;  %s259_s24 = scalar_lea.vmem [#allocation8], %s804_s18  ;;  %s807_s27 = sshll.u32 %s1058_s15, 2 }
  0x37   : > { %v1222_v2 = vld [vmem:[%s1209_s25 + $0x20] sm:$0xff]  ;;  %v1235_v6 = vld [vmem:[%s1202_s14 + $0x10] sm:$0xff]  ;;  %v1238_v7 = vld [vmem:[%s1209_s25 + $0x18] sm:$0xff]  ;;  %vm360_vm0 = vcmp.eq.f32.partialorder %v1219_v1, -2.0  ;;  %vm361_vm4 = vcmp.eq.f32.partialorder %v1229_v4, -2.0  ;;  %v404_v19 = vsub.f32 %v1216_v0, %v1219_v1  ;;  %v405_v20 = vsub.f32 %v1226_v3, %v1229_v4  ;;  %s657_s4 = scalar_lea.hbm %s1624_s3, %s807_s27  ;;  %s292_s15 = scalar_lea.vmem [#allocation9], %s805_s26 }
  0x38   : > { %v1241_v8 = vld [vmem:[%s1209_s25 + $0x28] sm:$0xff]  ;;  %v1244_v9 = vld [vmem:[%s1209_s25 + $0x40] sm:$0xff]  ;;  %vm364_vm1 = vcmp.eq.f32.partialorder %v1222_v2, -2.0  ;;  %v1258_v13 = vld [vmem:[%s1202_s14 + $0x18] sm:$0xff]  ;;  %vm362_vm6 = vcmp.eq.f32.partialorder %v1232_v5, -2.0  ;;  %vm363_vm7 = vcmp.eq.f32.partialorder %v1238_v7, -2.0  ;;  %v406_v27 = vsub.f32 %v1235_v6, %v1232_v5 }
  0x39   : > { %v1247_v10 = vld [vmem:[%s1209_s25 + $0x48] sm:$0xff]  ;;  %v1250_v11 = vld [vmem:[%s1209_s25 + $0x60] sm:$0xff]  ;;  %v1261_v14 = vld [vmem:[%s1209_s25 + $0x30] sm:$0xff]  ;;  %vm368_vm2 = vcmp.eq.f32.partialorder %v1244_v9, -2.0  ;;  %vm365_vm5 = vcmp.eq.f32.partialorder %v1241_v8, -2.0  ;;  %v407_v31 = vsub.f32 %v1258_v13, %v1238_v7  ;;  %s659_s19 = sshll.u32 %s292_s15, 4  ;;  %s660_s19 = int_to_ptr.vmem [resolvable:$true] %s659_s19 }
  0x3a   : > { %v1253_v12 = vld [vmem:[%s1209_s25 + $0x68] sm:$0xff]  ;;  %v1264_v15 = vld [vmem:[%s1209_s25 + $0x38] sm:$0xff]  ;;  %vm372_vm3 = vcmp.eq.f32.partialorder %v1250_v11, -2.0  ;;  %v1269_v16 = vld [vmem:[%s1202_s14 + $0x20] sm:$0xff]  ;;  %vm369_vm8 = vcmp.eq.f32.partialorder %v1247_v10, -2.0  ;;  %vm366_vm11 = vcmp.eq.f32.partialorder %v1261_v14, -2.0 }
  0x3b   : > { %v1272_v17 = vld [vmem:[%s1209_s25 + $0x50] sm:$0xff]  ;;  %v1284_v21 = vld [vmem:[%s1202_s14 + $0x28] sm:$0xff]  ;;  %v1287_v22 = vld [vmem:[%s1209_s25 + $0x58] sm:$0xff]  ;;  %vm373_vm9 = vcmp.eq.f32.partialorder %v1253_v12, -2.0  ;;  %vm367_vm12 = vcmp.eq.f32.partialorder %v1264_v15, -2.0  ;;  %v408_v36 = vsub.f32 %v1269_v16, %v1222_v2  ;;  %s661_s21 = sshll.u32 %s657_s4, 4  ;;  %s662_s21 = int_to_ptr.hbm [resolvable:$true] %s661_s21 }
  0x3c   : > { %v1275_v18 = vld [vmem:[%s1209_s25 + $0x70] sm:$0xff]  ;;  %vm376_vm10 = vmpackc.low %vm364_vm1, %vm360_vm0  ;;  %v1298_v23 = vld [vmem:[%s1209_s25 + $0x78] sm:$0xff]  ;;  %vm370_vm14 = vcmp.eq.f32.partialorder %v1272_v17, -2.0  ;;  %vm371_vm1 = vcmp.eq.f32.partialorder %v1287_v22, -2.0  ;;  %v409_v40 = vsub.f32 %v1284_v21, %v1241_v8  ;;  %v1416_v6 = vand.u32 2147483647, %v404_v19 }
  0x3d   : > { %v352_v24 = vld [vmem:[%s259_s24] sm:$0xff]  ;;  %vm377_vm13 = vmpackc.low %vm372_vm3, %vm368_vm2  ;;  %v378_v26 = vsel %vm376_vm10, 16711935, %v1070_v25  ;;  %v1312_v28 = vld [vmem:[%s1202_s14 + $0x30] sm:$0xff]  ;;  %vm374_vm15 = vcmp.eq.f32.partialorder %v1275_v18, -2.0  ;;  %s647_s23 = scalar_lea.sflag [#allocation5], %s1198_s1 }
  0x3e   : > { %v353_v29 = vld [vmem:[%s259_s24 + $0x8] sm:$0xff]  ;;  %v379_v30 = vsel %vm377_vm13, 16711935, %v1070_v25  ;;  %vm382_vm0 = vmpackc.low %vm365_vm5, %vm361_vm4  ;;  %v354_v32 = vld [vmem:[%s259_s24 + $0x10] sm:$0xff]  ;;  %vm356_vm3 = vnez %v352_v24  ;;  %vm375_vm4 = vcmp.eq.f32.partialorder %v1298_v23, -2.0  ;;  %v410_v46 = vsub.f32 %v1312_v28, %v1261_v14  ;;  %s994_s6 = sshra.s32 %s662_s21, 4  ;;  %s995_s6 = int_to_ptr.hbm [resolvable:$true] %s994_s6 }
  0x3f   : > { %v355_v33 = vld [vmem:[%s259_s24 + $0x18] sm:$0xff]  ;;  %v380_v34 = vpack.c.b8 %v379_v30, %v378_v26  ;;  %vm383_vm2 = vmpackc.low %vm373_vm9, %vm369_vm8  ;;  %v384_v35 = vsel %vm382_vm0, 16711935, %v1070_v25  ;;  %v1335_v38 = vld [vmem:[%s1202_s14 + $0x40] sm:$0xff]  ;;  %vm358_vm10 = vnez %v354_v32  ;;  %v1421_v7 = vand.u32 2147483647, %v405_v20  ;;  %p1001_p7 = scmp.lt.s32.totalorder %s995_s6, %s1624_s3 }
  0x40   : > { %v1332_v37 = vld [vmem:[%s1202_s14 + $0x38] sm:$0xff]  ;;  %v385_v39 = vsel %vm383_vm2, 16711935, %v1070_v25  ;;  %vm388_vm5 = vmpackc.low %vm366_vm11, %vm362_vm6  ;;  %v1346_v41 = vld [vmem:[%s1202_s14 + $0x48] sm:$0xff]  ;;  %vm357_vm6 = vnez %v353_v29  ;;  %vm359_vm11 = vnez %v355_v33  ;;  %v412_v57 = vsub.f32 %v1335_v38, %v1244_v9  ;;  %s996_s7 = scalar_lea.hbm %s995_s6, 4  ;;  %s1000_s5 = scalar_lea.hbm %s1624_s3, 8 }
  0x41   : > { %v1349_v42 = vld [vmem:[%s1202_s14 + $0x50] sm:$0xff]  ;;  %vm1351_vm8 = vnez %v380_v34  ;;  %v386_v44 = vpack.c.b8 %v385_v39, %v384_v35  ;;  %vm389_vm9 = vmpackc.low %vm374_vm15, %vm370_vm14  ;;  %v390_v45 = vsel %vm388_vm5, 16711935, %v1070_v25  ;;  %v1363_v47 = vld [vmem:[%s1202_s14 + $0x58] sm:$0xff]  ;;  %v411_v54 = vsub.f32 %v1332_v37, %v1264_v15  ;;  %p997_p4 = scmp.ne.s32.totalorder %s995_s6, %s996_s7  ;;  %p1002_p8 = scmp.lt.s32.totalorder %s1000_s5, %s996_s7 }
  0x42   : > { %v1366_v48 = vld [vmem:[%s1202_s14 + $0x60] sm:$0xff]  ;;  %v391_v49 = vsel %vm389_vm9, 16711935, %v1070_v25  ;;  %vm394_vm13 = vmpackc.low %vm367_vm12, %vm363_vm7  ;;  %v1374_v50 = vld [vmem:[%s1202_s14 + $0x68] sm:$0xff]  ;;  %v413_v58 = vsub.f32 %v1346_v41, %v1247_v10  ;;  %v414_v59 = vsub.f32 %v1349_v42, %v1272_v17  ;;  %v415_v62 = vsub.f32 %v1363_v47, %v1287_v22 }
  0x43   : > { %v1377_v51 = vld [vmem:[%s1202_s14 + $0x70] sm:$0xff]  ;;  %vm387_vm14 = vnez %v386_v44  ;;  %v392_v52 = vpack.c.b8 %v391_v49, %v390_v45  ;;  %vm395_vm15 = vmpackc.low %vm375_vm4, %vm371_vm1  ;;  %v396_v53 = vsel %vm394_vm13, 16711935, %v1070_v25  ;;  %v1401_v60 = vld [vmem:[%s1202_s14 + $0x78] sm:$0xff]  ;;  %v416_v63 = vsub.f32 %v1366_v48, %v1250_v11  ;;  %p998_p5 = pnand %p997_p4, %p1146_p9  ;;  %p1003_p10 = por %p1002_p8, %p1001_p7 }
  0x44   : > { %v397_v55 = vsel %vm395_vm15, 16711935, %v1070_v25  ;;  %vm1390_vm7 = vmor %vm356_vm3, %vm1351_vm8  ;;  %v417_v2 = vsub.f32 %v1374_v50, %v1253_v12  ;;  %v418_v5 = vsub.f32 %v1377_v51, %v1275_v18  ;;  %v1423_v9 = vand.u32 2147483647, %v406_v27 }
  0x45   : > { %vm393_vm12 = vnez %v392_v52  ;;  %v398_v61 = vpack.c.b8 %v397_v55, %v396_v53  ;;  %vm401_vm0 = vmor %vm357_vm6, %vm387_vm14  ;;  %v1425_v10 = vand.u32 2147483647, %v407_v31  ;;  %v1427_v11 = vand.u32 2147483647, %v408_v36  ;;  %p999_p6 = pneg %p998_p5 }
  0x46   : > { %vm402_vm1 = vmor %vm358_vm10, %vm393_vm12  ;;  %v419_v12 = vsub.f32 %v1401_v60, %v1298_v23  ;;  %v452_v0 = vsel %vm1390_vm7, 16843009, %v1070_v25  ;;  %v453_v1 = vsel %vm401_vm0, 16843009, %v1070_v25  ;;  %v1441_v41 = vand.u32 2147483647, %v409_v40 }
  0x47   : > { %vm399_vm2 = vnez %v398_v61  ;;  %v454_v3 = vsel %vm402_vm1, 16843009, %v1070_v25  ;;  %v456_v13 = vunpack.c.0.s8 %v452_v0  ;;  %v457_v15 = vunpack.c.0.s8 %v453_v1  ;;  %p1004_p13 = pnand %p1003_p10, %p999_p6 }
  0x48   : > { %vm403_vm3 = vmor %vm359_vm11, %vm399_vm2  ;;  %v458_v16 = vunpack.c.0.s8 %v454_v3  ;;  %v460_v18 = vunpack.c.1.s8 %v452_v0  ;;  %v461_v19 = vunpack.c.1.s8 %v453_v1  ;;  %v462_v20 = vunpack.c.1.s8 %v454_v3 }
  0x49   : > { %v455_v4 = vsel %vm403_vm3, 16843009, %v1070_v25  ;;  %v464_v24 = vunpack.c.2.s8 %v452_v0  ;;  %v465_v23 = vunpack.c.2.s8 %v453_v1  ;;  %v466_v26 = vunpack.c.2.s8 %v454_v3 }
  0x4a   : > { %v459_v17 = vunpack.c.0.s8 %v455_v4  ;;  %v463_v22 = vunpack.c.1.s8 %v455_v4  ;;  %v467_v27 = vunpack.c.2.s8 %v455_v4  ;;  %v468_v29 = vunpack.c.3.s8 %v452_v0 }
  0x4b   : > { %v469_v30 = vunpack.c.3.s8 %v453_v1  ;;  %v470_v31 = vunpack.c.3.s8 %v454_v3  ;;  %v471_v32 = vunpack.c.3.s8 %v455_v4  ;;  %v472_v33 = vpack.c.b16 %v457_v15, %v456_v13 }
  0x4c   : > { %v473_v34 = vpack.c.b16 %v459_v17, %v458_v16  ;;  %v475_v35 = vpack.c.b16 %v461_v19, %v460_v18  ;;  %v476_v36 = vpack.c.b16 %v463_v22, %v462_v20  ;;  %v478_v37 = vpack.c.b16 %v465_v23, %v464_v24 }
  0x4d   : > { %v479_v38 = vpack.c.b16 %v467_v27, %v466_v26  ;;  %v481_v39 = vpack.c.b16 %v469_v30, %v468_v29  ;;  %v1446_v42 = vand.u32 2147483647, %v410_v46  ;;  %v482_v44 = vpack.c.b16 %v471_v32, %v470_v31 }
  0x4e   : > { %v474_v43 = vpack.c.b8 %v473_v34, %v472_v33  ;;  %v1448_v45 = vand.u32 2147483647, %v411_v54  ;;  %v1450_v47 = vand.u32 2147483647, %v412_v57  ;;  %v477_v48 = vpack.c.b8 %v476_v36, %v475_v35 }
  0x4f   : > { %v480_v49 = vpack.c.b8 %v479_v38, %v478_v37  ;;  %v1452_v50 = vand.u32 2147483647, %v413_v58  ;;  %v1454_v51 = vand.u32 2147483647, %v414_v59  ;;  %v483_v8 = vpack.c.b8 %v482_v44, %v481_v39 }
  0x50   : > { %vm484_vm4 = vnez %v474_v43  ;;  %v1456_v21 = vand.u32 2147483647, %v415_v62  ;;  %vm485_vm5 = vnez %v477_v48  ;;  %v1459_v28 = vand.u32 2147483647, %v416_v63 }
  0x51   : > { %vm486_vm8 = vnez %v480_v49  ;;  %v488_v14 = vsel %vm484_vm4, 16843009, %v1070_v25  ;;  %v1461_v40 = vand.u32 2147483647, %v417_v2  ;;  %vm487_vm9 = vnez %v483_v8 }
  0x52   : > { %v489_v46 = vsel %vm485_vm5, 16843009, %v1070_v25  ;;  %v1464_v52 = vand.u32 2147483647, %v418_v5  ;;  %v1466_v53 = vand.u32 2147483647, %v419_v12  ;;  %v492_v55 = vunpack.c.0.s8 %v488_v14 }
  0x53   : > { %v490_v54 = vsel %vm486_vm8, 16843009, %v1070_v25  ;;  %v491_v56 = vsel %vm487_vm9, 16843009, %v1070_v25  ;;  %v493_v57 = vunpack.c.1.s8 %v488_v14  ;;  %v494_v58 = vunpack.c.2.s8 %v488_v14 }
  0x54   : > { %v495_v59 = vunpack.c.3.s8 %v488_v14  ;;  %v496_v60 = vunpack.c.0.s8 %v489_v46  ;;  %v497_v61 = vunpack.c.1.s8 %v489_v46  ;;  %v498_v62 = vunpack.c.2.s8 %v489_v46 }
  0x55   : > { %v499_v63 = vunpack.c.3.s8 %v489_v46  ;;  %v500_v2 = vunpack.c.0.s8 %v490_v54  ;;  %v501_v0 = vunpack.c.1.s8 %v490_v54  ;;  %v502_v1 = vunpack.c.2.s8 %v490_v54 }
  0x56   : > { %v503_v3 = vunpack.c.3.s8 %v490_v54  ;;  %v504_v5 = vunpack.c.0.s8 %v491_v56  ;;  %v505_v4 = vunpack.c.1.s8 %v491_v56  ;;  %v506_v12 = vunpack.c.2.s8 %v491_v56 }
  0x57   : > { %v507_v13 = vunpack.c.3.s8 %v491_v56  ;;  %vm1470_vm6 = vcmp.ne.s32.totalorder %v492_v55, 0  ;;  %vm1474_vm10 = vcmp.ne.s32.totalorder %v493_v57, 0  ;;  %vm1478_vm11 = vcmp.ne.s32.totalorder %v494_v58, 0 }
  0x58   : > { %vm1482_vm13 = vcmp.ne.s32.totalorder %v495_v59, 0  ;;  %vm1486_vm14 = vcmp.ne.s32.totalorder %v496_v60, 0  ;;  %vm1490_vm15 = vcmp.ne.s32.totalorder %v497_v61, 0  ;;  %vm1494_vm7 = vcmp.ne.s32.totalorder %v498_v62, 0 }
  0x59   : > { %vm1498_vm12 = vcmp.ne.s32.totalorder %v499_v63, 0  ;;  %vm1502_vm0 = vcmp.ne.s32.totalorder %v500_v2, 0  ;;  %vm1506_vm1 = vcmp.ne.s32.totalorder %v501_v0, 0  ;;  %vm1510_vm2 = vcmp.ne.s32.totalorder %v502_v1, 0 }
  0x5a   : > { %vm1514_vm3 = vcmp.ne.s32.totalorder %v503_v3, 0  ;;  %v524_v29 = vsel %vm1470_vm6, 0.0, %v1416_v6  ;;  %v525_v30 = vsel %vm1474_vm10, 0.0, %v1421_v7  ;;  %v526_v31 = vsel %vm1478_vm11, 0.0, %v1423_v9 }
  0x5b   : > { %v527_v32 = vsel %vm1482_vm13, 0.0, %v1425_v10  ;;  %v528_v33 = vsel %vm1486_vm14, 0.0, %v1427_v11  ;;  %v529_v6 = vsel %vm1490_vm15, 0.0, %v1441_v41  ;;  %v530_v7 = vsel %vm1494_vm7, 0.0, %v1446_v42 }
  0x5c   : > { %v531_v9 = vsel %vm1498_vm12, 0.0, %v1448_v45  ;;  %vm1542_vm4 = vcmp.ne.s32.totalorder %v504_v5, 0  ;;  %vm1546_vm5 = vcmp.ne.s32.totalorder %v505_v4, 0  ;;  %vm1550_vm8 = vcmp.ne.s32.totalorder %v506_v12, 0 }
  0x5d   : > { %vm1554_vm9 = vcmp.ne.s32.totalorder %v507_v13, 0  ;;  %v532_v36 = vsel %vm1502_vm0, 0.0, %v1450_v47  ;;  %v533_v37 = vsel %vm1506_vm1, 0.0, %v1452_v50  ;;  %v534_v38 = vsel %vm1510_vm2, 0.0, %v1454_v51 }
  0x5e   : > { %v535_v39 = vsel %vm1514_vm3, 0.0, %v1456_v21  ;;  %v591_v41 = vadd.f32 %v528_v33, %v524_v29  ;;  %v600_v42 = vadd.f32 %v529_v6, %v525_v30  ;;  %v609_v43 = vadd.f32 %v530_v7, %v526_v31 }
  0x5f   : > { %v618_v44 = vadd.f32 %v531_v9, %v527_v32  ;;  %v536_v45 = vsel %vm1542_vm4, 0.0, %v1459_v28  ;;  %v537_v47 = vsel %vm1546_vm5, 0.0, %v1461_v40  ;;  %v538_v48 = vsel %vm1550_vm8, 0.0, %v1464_v52 }
  0x60   : > { %v539_v49 = vsel %vm1554_vm9, 0.0, %v1466_v53  ;;  %v592_v50 = vadd.f32 %v591_v41, %v532_v36  ;;  %v601_v51 = vadd.f32 %v600_v42, %v533_v37  ;;  %v610_v8 = vadd.f32 %v609_v43, %v534_v38 }
  0x61   : > { %v619_v21 = vadd.f32 %v618_v44, %v535_v39  ;;  %v641_v15 = vlaneseq  ;;  %vm634_vm6 = vcmask 1040384   ;;  %vm636_vm10 = vcmask 1042434  }
  0x62   : > { %v593_v14 = vadd.f32 %v592_v50, %v536_v45  ;;  %v602_v46 = vadd.f32 %v601_v51, %v537_v47  ;;  %v611_v28 = vadd.f32 %v610_v8, %v538_v48  ;;  %vm638_vm11 = vcmask 1041408  }
  0x63   : > { %v620_v54 = vadd.f32 %v619_v21, %v539_v49  ;;  %vm643_vm13 = vcmp.lt.s32.totalorder %v641_v15, 512 }
  0x64   : > { %v594_v55 = vrot.slane %v593_v14, 4  ;;  %v603_v40 = vrot.slane %v602_v46, 4  ;;  %v612_v56 = vrot.slane %v611_v28, 4 }
  0x65   : > { %v621_v57 = vrot.slane %v620_v54, 4 }
  0x66   : > { %v595_v58 = vadd.f32 %v594_v55, %v593_v14  ;;  %v604_v52 = vadd.f32 %v603_v40, %v602_v46  ;;  %v613_v59 = vadd.f32 %v612_v56, %v611_v28 }
  0x67   : > { %v622_v60 = vadd.f32 %v621_v57, %v620_v54 }
  0x68   : > { %v596_v61 = vrot.slane %v595_v58, 2  ;;  %v605_v53 = vrot.slane %v604_v52, 2  ;;  %v614_v62 = vrot.slane %v613_v59, 2 }
  0x69   : > { %v623_v63 = vrot.slane %v622_v60, 2 }
  0x6a   : > { %v597_v2 = vadd.f32 %v596_v61, %v595_v58  ;;  %v606_v0 = vadd.f32 %v605_v53, %v604_v52  ;;  %v615_v1 = vadd.f32 %v614_v62, %v613_v59 }
  0x6b   : > { %v624_v3 = vadd.f32 %v623_v63, %v622_v60 }
  0x6c   : > { %v598_v5 = vrot.slane %v597_v2, 1  ;;  %v607_v4 = vrot.slane %v606_v0, 1  ;;  %v616_v12 = vrot.slane %v615_v1, 1 }
  0x6d   : > { %v625_v13 = vrot.slane %v624_v3, 1 }
  0x6e   : > { %v599_v25 = vadd.f32 %v598_v5, %v597_v2  ;;  %v608_v16 = vadd.f32 %v607_v4, %v606_v0  ;;  %v617_v17 = vadd.f32 %v616_v12, %v615_v1 }
  0x6f   : > { %v626_v18 = vadd.f32 %v625_v13, %v624_v3 }
  0x70   : > { %v631_v19 = vrot.slane %v608_v16, 7  ;;  %v632_v20 = vrot.slane %v617_v17, 6 }
  0x71   : > { %v633_v22 = vrot.slane %v626_v18, 5 }
  0x72   : > { %v635_v24 = vsel %vm634_vm6, %v599_v25, %v631_v19 }
  0x73   : > { %v637_v23 = vsel %vm636_vm10, %v632_v20, %v633_v22 }
  0x74   : > { %v639_v26 = vsel %vm638_vm11, %v635_v24, %v637_v23 }
  0x75   : > { %645 = vst.msk [vmem:[%s292_s15] sm:$0xf] %vm643_vm13, %v639_v26 }
  0x76   : > { %1007 = shalt.err (!%p1004_p13)
}
  0x77   : > { %821 = dma.vmem_to_hbm [thread:$0]  (%p1146_p9), %s660_s19, 64, %s662_s21, %s647_s23  }
  0x78 PF: > { %s1685_s1 = sld [smem:[#allocation13_spill]]  ;;  %p834_p0 = pnand %p789_p12, %p1153_p11 }
  0x79   : > { %s1687_s28 = sld [smem:[#allocation15_spill]] }
  0x7a   : > { %p835_p1 = pneg %p834_p0 }
  0x7e   : > { %s673_s14 = sand.u32 1, %s1685_s1  }
  0x7f   : > { %s674_s12 = scalar_lea.sflag [#allocation5], %s673_s14 }
  0x80   : > { %1041 = dma.done.wait (%p835_p1), %s674_s12, 64  }
  0x81   : > { %1043 = vsyncadd (%p835_p1), %s674_s12, 4294967232  ;;  %s22_s17 = sadd.s32 1, %s1687_s28   ;;  %s1688_s25 = sld [smem:[#allocation14_spill]] }
  0x82   : > { %p19_p2 = scmp.ge.s32.totalorder %s22_s17, 4   ;;  %s1689_s14 = sld [smem:[#allocation18_spill]] }
  0x83   : > { %s1690_s18 = sld [smem:[#allocation16_spill]]  ;;  %s1691_s12 = smov %s1050_s13 }
  0x84   : > { %s1693_s15 = smov %s1062_s16 }
  0x85   :  { %21 = sbr.rel (!%p19_p2) target bundleno = 10 (0xa), region = 109 }
  0x87   : > { %s1692_s13 = smov %s1688_s25 }
  0x89   : > { %s1694_s16 = smov %s1690_s18 }
  0x8a   :  { %680 = vsyncpa [#allocation4], 1 }
  0x8b   :  { %682 = vsyncpa [#allocation4 + $0x1], 1 }
  0x8c   :  { %683 = vsyncpa [#allocation7], 1 }
  0x8d   :  { %685 = vsyncpa [#allocation7 + $0x1], 1 }
  0x8e   :  { %686 = vsyncpa [#allocation5], 1 }
  0x8f   :  { %688 = vsyncpa [#allocation5 + $0x1], 1 }

</bundles_post_ra>
